<compile_context>
chip_gen: v5e
topology: v5e:2x2
jax: 0.10.0
libtpu: 0.0.40
codegen_flags: <defaults>
</compile_context>

<pallas_src>
import functools

import jax
import jax.numpy as jnp
from jax.experimental import pallas as pl
from jax.experimental.pallas import tpu as pltpu

H1 = 512
H2 = 256


def discriminator_kernel(x_ref, w1_ref, b1_ref, w2_ref, b2_ref, w3_ref, b3_ref,
                         out_ref):
    """One (TM, IN) batch tile of the fused MLP. Weights are VMEM-resident."""
    x = x_ref[...]  # (TM, IN) f32

    # Linear 1 (bf16 MXU, f32 accumulate) + LeakyReLU(0.2) in f32
    h = jnp.dot(x.astype(jnp.bfloat16), w1_ref[...],
                preferred_element_type=jnp.float32) + b1_ref[...]
    h = jnp.where(h > 0, h, 0.2 * h)

    # Linear 2 (bf16 MXU, f32 accumulate) + LeakyReLU(0.2) in f32
    h = jnp.dot(h.astype(jnp.bfloat16), w2_ref[...],
                preferred_element_type=jnp.float32) + b2_ref[...]
    h = jnp.where(h > 0, h, 0.2 * h)

    # Linear 3 (out_features = 1): broadcast-multiply + lane reduction on the
    # VPU/XLU instead of a 1-column MXU matmul.
    logit = jnp.sum(h * w3_ref[...], axis=-1, keepdims=True) + b3_ref[...]

    # Sigmoid on the EUP (exp) without an explicit f32 divide.
    out_ref[...] = jax.nn.sigmoid(logit)


def _choose_tm(batch):
    """Row-tile: multiple of 8 (f32 sublane), capped at 512 rows per step."""
    if batch >= 512:
        return 512
    return max(8, ((batch + 7) // 8) * 8)


@functools.partial(jax.jit, static_argnames=())
def discriminator_forward(img, params):
    """img: (B, C, H, W) float32 (NCHW, matching PyTorch). Returns (B, 1) f32."""
    w1, b1, w2, b2, w3, b3 = params
    B = img.shape[0]
    x = img.reshape(B, -1).astype(jnp.float32)  # flatten, as in PyTorch forward
    in_features = x.shape[1]

    # MXU operands in bf16 (halves weight DMA, ~2-4x MXU rate); f32 accumulate
    # happens inside the kernel. In a real training loop store these bf16.
    w1b = w1.astype(jnp.bfloat16)
    w2b = w2.astype(jnp.bfloat16)
    w3r = w3.reshape(1, H2).astype(jnp.float32)   # row vector for the reduction
    b3r = b3.reshape(1, 1).astype(jnp.float32)

    # Pad the batch to a multiple of the row tile (>= 8) so the MXU sees
    # full-height tiles; slice the result back afterwards.
    TM = _choose_tm(B)
    B_pad = pl.cdiv(B, TM) * TM
    if B_pad != B:
        x = jnp.pad(x, ((0, B_pad - B), (0, 0)))
    grid = (B_pad // TM,)

    bytes_accessed = (
        x.size * 4 + w1b.size * 2 + b1.size * 4 + w2b.size * 2 + b2.size * 4
        + w3r.size * 4 + b3r.size * 4 + B_pad * 4
    )
    cost = pl.CostEstimate(
        flops=2 * B_pad * (in_features * H1 + H1 * H2 + H2),
        transcendentals=B_pad,  # sigmoid exp
        bytes_accessed=bytes_accessed,
    )

    out = pl.pallas_call(
        discriminator_kernel,
        out_shape=jax.ShapeDtypeStruct((B_pad, 1), jnp.float32),
        grid=grid,
        in_specs=[
            # Activations: tiled along the batch grid axis.
            pl.BlockSpec((TM, in_features), lambda i: (i, 0)),
            # Weights / biases: constant index_map -> DMA'd once, VMEM-resident.
            pl.BlockSpec((in_features, H1), lambda i: (0, 0)),
            pl.BlockSpec((1, H1), lambda i: (0, 0)),
            pl.BlockSpec((H1, H2), lambda i: (0, 0)),
            pl.BlockSpec((1, H2), lambda i: (0, 0)),
            pl.BlockSpec((1, H2), lambda i: (0, 0)),
            pl.BlockSpec((1, 1), lambda i: (0, 0)),
        ],
        out_specs=pl.BlockSpec((TM, 1), lambda i: (i, 0)),
        compiler_params=pltpu.CompilerParams(
            dimension_semantics=("parallel",),  # shards batch grid across v7x TCs
        ),
        cost_estimate=cost,
    )(x, w1b, b1, w2b, b2, w3r, b3r)

    return out[:B]


def init_params(key, in_features, h1=H1, h2=H2, out_features=1):
    """PyTorch-Linear-style init: U(-1/sqrt(fan_in), 1/sqrt(fan_in)).

    Weights stored as (in, out) so the kernel does x @ W + b.
    """
    ks = jax.random.split(key, 6)

    def lin(kw, kb, fin, fout):
        bound = 1.0 / jnp.sqrt(float(fin))
        w = jax.random.uniform(kw, (fin, fout), jnp.float32, -bound, bound)
        b = jax.random.uniform(kb, (1, fout), jnp.float32, -bound, bound)
        return w, b

    w1, b1 = lin(ks[0], ks[1], in_features, h1)
    w2, b2 = lin(ks[2], ks[3], h1, h2)
    w3, b3 = lin(ks[4], ks[5], h2, out_features)
    return (w1, b1, w2, b2, w3, b3)


def _reference_forward(img, params):
    """Pure-JAX f32 reference for correctness checking."""
    w1, b1, w2, b2, w3, b3 = params
    x = img.reshape(img.shape[0], -1)
    h = x @ w1 + b1
    h = jnp.where(h > 0, h, 0.2 * h)
    h = h @ w2 + b2
    h = jnp.where(h > 0, h, 0.2 * h)
    return jax.nn.sigmoid(h @ w3 + b3)


if __name__ == "__main__":
    # Small shapes consistent with the module: img_shape = (channels, img_size, img_size)
    B, C, H, W = 2, 1, 16, 16
    in_features = C * H * W  # 256

    key = jax.random.PRNGKey(0)
    k_img, k_params = jax.random.split(key)

    img = jax.random.normal(k_img, (B, C, H, W), jnp.float32)
    params = init_params(k_params, in_features)

    validity = discriminator_forward(img, params)
    validity = jax.block_until_ready(validity)

    ref = _reference_forward(img, params)

    assert validity.shape == (B, 1)
    assert bool(jnp.all((validity >= 0.0) & (validity <= 1.0)))
    # bf16 MXU operands with f32 accumulation -> loose tolerance vs f32 ref.
    assert bool(jnp.allclose(validity, ref, atol=5e-2, rtol=5e-2))
    print("KERNEL_OK")
</pallas_src>

<mosaic_0001>
module attributes {stable_mosaic.version = 11 : i64} {
  func.func @discriminator_kernel(%arg0: i32, %arg1: memref<8x256xf32, #tpu.memory_space<vmem>>, %arg2: memref<256x512xbf16, #tpu.memory_space<vmem>>, %arg3: memref<1x512xf32, #tpu.memory_space<vmem>>, %arg4: memref<512x256xbf16, #tpu.memory_space<vmem>>, %arg5: memref<1x256xf32, #tpu.memory_space<vmem>>, %arg6: memref<1x256xf32, #tpu.memory_space<vmem>>, %arg7: memref<1x1xf32, #tpu.memory_space<vmem>>, %arg8: memref<8x1xf32, #tpu.memory_space<vmem>>) attributes {dimension_semantics = [#tpu.dimension_semantics<parallel>], iteration_bounds = array<i64: 1>, scalar_prefetch = 0 : i64, scratch_operands = 0 : i64, tpu.core_type = #tpu.core_type<tc>, window_params = [{transform_indices = @transform_0, window_bounds = array<i64: 8, 256>}, {pipeline_mode = #tpu.pipeline_mode<synchronous>, transform_indices = @transform_1, window_bounds = array<i64: 256, 512>}, {pipeline_mode = #tpu.pipeline_mode<synchronous>, transform_indices = @transform_2, window_bounds = array<i64: 1, 512>}, {pipeline_mode = #tpu.pipeline_mode<synchronous>, transform_indices = @transform_3, window_bounds = array<i64: 512, 256>}, {pipeline_mode = #tpu.pipeline_mode<synchronous>, transform_indices = @transform_4, window_bounds = array<i64: 1, 256>}, {pipeline_mode = #tpu.pipeline_mode<synchronous>, transform_indices = @transform_5, window_bounds = array<i64: 1, 256>}, {pipeline_mode = #tpu.pipeline_mode<synchronous>, transform_indices = @transform_6, window_bounds = array<i64: 1, 1>}, {transform_indices = @transform_7, window_bounds = array<i64: 8, 1>}]} {
    %c0 = arith.constant 0 : index
    %c0_0 = arith.constant 0 : index
    %0 = vector.load %arg1[%c0, %c0_0] : memref<8x256xf32, #tpu.memory_space<vmem>>, vector<8x256xf32>
    %1 = arith.truncf %0 : vector<8x256xf32> to vector<8x256xbf16>
    %c0_1 = arith.constant 0 : index
    %c0_2 = arith.constant 0 : index
    %2 = vector.load %arg2[%c0_1, %c0_2] : memref<256x512xbf16, #tpu.memory_space<vmem>>, vector<256x512xbf16>
    %cst = arith.constant dense<0.000000e+00> : vector<8x512xf32>
    %3 = tpu.matmul %1, %2, %cst {dimension_numbers = #tpu.dot_dimension_numbers<[1], [0], [0], [1], [0, 0, 1, 1], [], []>} : vector<8x256xbf16>, vector<256x512xbf16>, vector<8x512xf32> -> vector<8x512xf32>
    %c0_3 = arith.constant 0 : index
    %c0_4 = arith.constant 0 : index
    %4 = vector.load %arg3[%c0_3, %c0_4] : memref<1x512xf32, #tpu.memory_space<vmem>>, vector<1x512xf32>
    %5 = vector.broadcast %4 : vector<1x512xf32> to vector<8x512xf32>
    %6 = arith.addf %3, %5 : vector<8x512xf32>
    %cst_5 = arith.constant 0.000000e+00 : f32
    %7 = vector.broadcast %cst_5 : f32 to vector<8x512xf32>
    %8 = arith.cmpf ogt, %6, %7 : vector<8x512xf32>
    %cst_6 = arith.constant 2.000000e-01 : f32
    %9 = vector.broadcast %cst_6 : f32 to vector<8x512xf32>
    %10 = arith.mulf %9, %6 : vector<8x512xf32>
    %11 = arith.select %8, %6, %10 : vector<8x512xi1>, vector<8x512xf32>
    %12 = arith.truncf %11 : vector<8x512xf32> to vector<8x512xbf16>
    %c0_7 = arith.constant 0 : index
    %c0_8 = arith.constant 0 : index
    %13 = vector.load %arg4[%c0_7, %c0_8] : memref<512x256xbf16, #tpu.memory_space<vmem>>, vector<512x256xbf16>
    %cst_9 = arith.constant dense<0.000000e+00> : vector<8x256xf32>
    %14 = tpu.matmul %12, %13, %cst_9 {dimension_numbers = #tpu.dot_dimension_numbers<[1], [0], [0], [1], [0, 0, 1, 1], [], []>} : vector<8x512xbf16>, vector<512x256xbf16>, vector<8x256xf32> -> vector<8x256xf32>
    %c0_10 = arith.constant 0 : index
    %c0_11 = arith.constant 0 : index
    %15 = vector.load %arg5[%c0_10, %c0_11] : memref<1x256xf32, #tpu.memory_space<vmem>>, vector<1x256xf32>
    %16 = vector.broadcast %15 : vector<1x256xf32> to vector<8x256xf32>
    %17 = arith.addf %14, %16 : vector<8x256xf32>
    %cst_12 = arith.constant 0.000000e+00 : f32
    %18 = vector.broadcast %cst_12 : f32 to vector<8x256xf32>
    %19 = arith.cmpf ogt, %17, %18 : vector<8x256xf32>
    %cst_13 = arith.constant 2.000000e-01 : f32
    %20 = vector.broadcast %cst_13 : f32 to vector<8x256xf32>
    %21 = arith.mulf %20, %17 : vector<8x256xf32>
    %22 = arith.select %19, %17, %21 : vector<8x256xi1>, vector<8x256xf32>
    %c0_14 = arith.constant 0 : index
    %c0_15 = arith.constant 0 : index
    %23 = vector.load %arg6[%c0_14, %c0_15] : memref<1x256xf32, #tpu.memory_space<vmem>>, vector<1x256xf32>
    %24 = vector.broadcast %23 : vector<1x256xf32> to vector<8x256xf32>
    %25 = arith.mulf %22, %24 : vector<8x256xf32>
    %cst_16 = arith.constant dense<0.000000e+00> : vector<8xf32>
    %26 = vector.multi_reduction <add>, %25, %cst_16 [1] : vector<8x256xf32> to vector<8xf32>
    %27 = vector.shape_cast %26 : vector<8xf32> to vector<8x1xf32>
    %c0_17 = arith.constant 0 : index
    %c0_18 = arith.constant 0 : index
    %28 = vector.load %arg7[%c0_17, %c0_18] : memref<1x1xf32, #tpu.memory_space<vmem>>, vector<1x1xf32>
    %29 = vector.broadcast %28 : vector<1x1xf32> to vector<8x1xf32>
    %30 = arith.addf %27, %29 : vector<8x1xf32>
    %31 = arith.negf %30 : vector<8x1xf32>
    %32 = math.exp %31 : vector<8x1xf32>
    %cst_19 = arith.constant 1.000000e+00 : f32
    %33 = vector.broadcast %cst_19 : f32 to vector<8x1xf32>
    %34 = arith.addf %33, %32 : vector<8x1xf32>
    %35 = arith.divf %33, %34 : vector<8x1xf32>
    %c0_20 = arith.constant 0 : index
    %c0_21 = arith.constant 0 : index
    %36 = vector.load %arg8[%c0_20, %c0_21] : memref<8x1xf32, #tpu.memory_space<vmem>>, vector<8x1xf32>
    tpu.vector_store %arg8[%c0_20, %c0_21], %35 {strides = array<i32>} : memref<8x1xf32, #tpu.memory_space<vmem>>, vector<8x1xf32>,
    return
  }
  func.func @transform_0(%arg0: i32) -> (i32, i32) {
    %c0_i32 = arith.constant 0 : i32
    %c0_i32_0 = arith.constant 0 : i32
    return %arg0, %c0_i32 : i32, i32
  }
  func.func @transform_1(%arg0: i32) -> (i32, i32) {
    %c0_i32 = arith.constant 0 : i32
    %c0_i32_0 = arith.constant 0 : i32
    %c0_i32_1 = arith.constant 0 : i32
    return %c0_i32, %c0_i32_0 : i32, i32
  }
  func.func @transform_2(%arg0: i32) -> (i32, i32) {
    %c0_i32 = arith.constant 0 : i32
    %c0_i32_0 = arith.constant 0 : i32
    %c0_i32_1 = arith.constant 0 : i32
    return %c0_i32, %c0_i32_0 : i32, i32
  }
  func.func @transform_3(%arg0: i32) -> (i32, i32) {
    %c0_i32 = arith.constant 0 : i32
    %c0_i32_0 = arith.constant 0 : i32
    %c0_i32_1 = arith.constant 0 : i32
    return %c0_i32, %c0_i32_0 : i32, i32
  }
  func.func @transform_4(%arg0: i32) -> (i32, i32) {
    %c0_i32 = arith.constant 0 : i32
    %c0_i32_0 = arith.constant 0 : i32
    %c0_i32_1 = arith.constant 0 : i32
    return %c0_i32, %c0_i32_0 : i32, i32
  }
  func.func @transform_5(%arg0: i32) -> (i32, i32) {
    %c0_i32 = arith.constant 0 : i32
    %c0_i32_0 = arith.constant 0 : i32
    %c0_i32_1 = arith.constant 0 : i32
    return %c0_i32, %c0_i32_0 : i32, i32
  }
  func.func @transform_6(%arg0: i32) -> (i32, i32) {
    %c0_i32 = arith.constant 0 : i32
    %c0_i32_0 = arith.constant 0 : i32
    %c0_i32_1 = arith.constant 0 : i32
    return %c0_i32, %c0_i32_0 : i32, i32
  }
  func.func @transform_7(%arg0: i32) -> (i32, i32) {
    %c0_i32 = arith.constant 0 : i32
    %c0_i32_0 = arith.constant 0 : i32
    return %arg0, %c0_i32 : i32, i32
  }
}

</mosaic_0001>

<bundles_post_ra>
// kernel: discriminator_forward.1
= control target key start
LH: loop header
LB: loop body
LE: loop exit
PB: predicated region body
PF: predicated region fallthrough
CT: control target
= control target key end

     0   :  { %vm1081_vm9 = vcmask 7168   ;;  %s2580_s1 = inlined_call_operand.vmem [shape: bf16[256,512], index: 1, kind: input, shape index: {}]   ;;  %s2581_s0 = inlined_call_operand.vmem [shape: f32[8,256], index: 0, kind: input, shape index: {}]   ;;  %s2582_s3 = inlined_call_operand.vmem [shape: bf16[512,256], index: 3, kind: input, shape index: {}]   ;;  %s2583_s2 = inlined_call_operand.vmem [shape: f32[1,512], index: 2, kind: input, shape index: {}]   ;;  %s2584_s6 = inlined_call_operand.<no memory space> [shape: f32[1,1], index: 6, kind: input, shape index: {}]   ;;  %s2585_s4 = inlined_call_operand.vmem [shape: f32[1,256], index: 4, kind: input, shape index: {}]   ;;  %s2586_s5 = inlined_call_operand.vmem [shape: f32[1,256], index: 5, kind: input, shape index: {}]   ;;  %s2587_s7 = inlined_call_operand.vmem [shape: f32[8,1], index: 7, kind: output, shape index: {}]  }
   0x1   :  { %v1201_v0 = vld [vmem:[%s2580_s1 + $0xe0] sm:$0xf]  ;;  %v1630_v1 = vld [vmem:[%s2580_s1 + $0xec] sm:$0xf0]  ;;  %v1628_v5 = vld [vmem:[%s2580_s1 + $0xe4] sm:$0xf] }
   0x2   :  { %v1329_v2 = vld [vmem:[%s2580_s1 + $0x1e0] sm:$0xf]  ;;  %v1202_v3 = vor.u32 %v1630_v1, %v1201_v0  ;;  %v1662_v4 = vld [vmem:[%s2580_s1 + $0x1ec] sm:$0xf0]  ;;  %v1203_v6 = vld [vmem:[%s2580_s1 + $0xf0] sm:$0xf0] }
   0x3   :  { %v1330_v7 = vor.u32 %v1662_v4, %v1329_v2  ;;  %v1206_v8 = vor.u32 %v1628_v5, %v1203_v6  ;;  %v1660_v9 = vld [vmem:[%s2580_s1 + $0x1e4] sm:$0xf]  ;;  %v1331_v10 = vld [vmem:[%s2580_s1 + $0x1f0] sm:$0xf0]  ;;  %v1185_v11 = vld [vmem:[%s2580_s1 + $0xc0] sm:$0xf] }
   0x4   :  { %426 = vmatpush.bf16.msra.mxu0 %v1202_v3  ;;  %v1334_v12 = vor.u32 %v1660_v9, %v1331_v10  ;;  %v1626_v13 = vld [vmem:[%s2580_s1 + $0xcc] sm:$0xf0]  ;;  %v1313_v14 = vld [vmem:[%s2580_s1 + $0x1c0] sm:$0xf]  ;;  %v1624_v18 = vld [vmem:[%s2580_s1 + $0xc4] sm:$0xf] }
   0x5   :  { %v1658_v15 = vld [vmem:[%s2580_s1 + $0x1cc] sm:$0xf0]  ;;  %439 = vmatpush.bf16.msra.mxu1 %v1330_v7  ;;  %452 = vmatpush.bf16.msra.mxu2 %v1206_v8  ;;  %v1186_v16 = vor.u32 %v1626_v13, %v1185_v11  ;;  %v1187_v19 = vld [vmem:[%s2580_s1 + $0xd0] sm:$0xf0]  ;;  %v1656_v20 = vld [vmem:[%s2580_s1 + $0x1c4] sm:$0xf] }
   0x6   :  { %v1314_v17 = vor.u32 %v1658_v15, %v1313_v14  ;;  %465 = vmatpush.bf16.msra.mxu3 %v1334_v12  ;;  %v1190_v21 = vor.u32 %v1624_v18, %v1187_v19  ;;  %v1315_v22 = vld [vmem:[%s2580_s1 + $0x1d0] sm:$0xf0]  ;;  %v1169_v23 = vld [vmem:[%s2580_s1 + $0xa0] sm:$0xf]  ;;  %v1622_v24 = vld [vmem:[%s2580_s1 + $0xac] sm:$0xf0] }
   0x7   :  { %v1318_v25 = vor.u32 %v1656_v20, %v1315_v22  ;;  %v1297_v26 = vld [vmem:[%s2580_s1 + $0x1a0] sm:$0xf]  ;;  %v1654_v27 = vld [vmem:[%s2580_s1 + $0x1ac] sm:$0xf0]  ;;  %v1620_v28 = vld [vmem:[%s2580_s1 + $0xa4] sm:$0xf]  ;;  %v1170_v29 = vor.u32 %v1622_v24, %v1169_v23 }
   0x8   :  { %427 = vmatpush.bf16.msra.mxu0 %v1186_v16  ;;  %v1171_v30 = vld [vmem:[%s2580_s1 + $0xb0] sm:$0xf0]  ;;  %v1652_v31 = vld [vmem:[%s2580_s1 + $0x1a4] sm:$0xf]  ;;  %v1298_v33 = vor.u32 %v1654_v27, %v1297_v26  ;;  %v1153_v35 = vld [vmem:[%s2580_s1 + $0x80] sm:$0xf] }
   0x9   :  { %v1299_v32 = vld [vmem:[%s2580_s1 + $0x1b0] sm:$0xf0]  ;;  %440 = vmatpush.bf16.msra.mxu1 %v1314_v17  ;;  %453 = vmatpush.bf16.msra.mxu2 %v1190_v21  ;;  %v1174_v34 = vor.u32 %v1620_v28, %v1171_v30  ;;  %v1618_v36 = vld [vmem:[%s2580_s1 + $0x8c] sm:$0xf0]  ;;  %v1281_v37 = vld [vmem:[%s2580_s1 + $0x180] sm:$0xf] }
   0xa   :  { %466 = vmatpush.bf16.msra.mxu3 %v1318_v25  ;;  %v1302_v38 = vor.u32 %v1652_v31, %v1299_v32  ;;  %v1650_v39 = vld [vmem:[%s2580_s1 + $0x18c] sm:$0xf0]  ;;  %v1616_v40 = vld [vmem:[%s2580_s1 + $0x84] sm:$0xf]  ;;  %v1155_v41 = vld [vmem:[%s2580_s1 + $0x90] sm:$0xf0]  ;;  %v1154_v44 = vor.u32 %v1618_v36, %v1153_v35 }
   0xb   :  { %v1648_v42 = vld [vmem:[%s2580_s1 + $0x184] sm:$0xf]  ;;  %v1283_v43 = vld [vmem:[%s2580_s1 + $0x190] sm:$0xf0]  ;;  %v1282_v45 = vor.u32 %v1650_v39, %v1281_v37  ;;  %v1158_v46 = vor.u32 %v1616_v40, %v1155_v41  ;;  %v1137_v47 = vld [vmem:[%s2580_s1 + $0x60] sm:$0xf] }
   0xc   :  { %428 = vmatpush.bf16.msra.mxu0 %v1170_v29  ;;  %v1614_v48 = vld [vmem:[%s2580_s1 + $0x6c] sm:$0xf0]  ;;  %v1265_v49 = vld [vmem:[%s2580_s1 + $0x160] sm:$0xf]  ;;  %v1286_v50 = vor.u32 %v1648_v42, %v1283_v43  ;;  %v1612_v52 = vld [vmem:[%s2580_s1 + $0x64] sm:$0xf] }
   0xd   :  { %441 = vmatpush.bf16.msra.mxu1 %v1298_v33  ;;  %454 = vmatpush.bf16.msra.mxu2 %v1174_v34  ;;  %v1646_v51 = vld [vmem:[%s2580_s1 + $0x16c] sm:$0xf0]  ;;  %v1139_v53 = vld [vmem:[%s2580_s1 + $0x70] sm:$0xf0]  ;;  %v1644_v54 = vld [vmem:[%s2580_s1 + $0x164] sm:$0xf]  ;;  %v1138_v56 = vor.u32 %v1614_v48, %v1137_v47 }
   0xe   :  { %467 = vmatpush.bf16.msra.mxu3 %v1302_v38  ;;  %v1267_v55 = vld [vmem:[%s2580_s1 + $0x170] sm:$0xf0]  ;;  %v1266_v57 = vor.u32 %v1646_v51, %v1265_v49  ;;  %v1142_v58 = vor.u32 %v1612_v52, %v1139_v53  ;;  %v1121_v59 = vld [vmem:[%s2580_s1 + $0x40] sm:$0xf]  ;;  %v1610_v60 = vld [vmem:[%s2580_s1 + $0x4c] sm:$0xf0] }
   0xf   :  { %v1249_v61 = vld [vmem:[%s2580_s1 + $0x140] sm:$0xf]  ;;  %v1270_v62 = vor.u32 %v1644_v54, %v1267_v55  ;;  %v1642_v63 = vld [vmem:[%s2580_s1 + $0x14c] sm:$0xf0]  ;;  %v1608_v0 = vld [vmem:[%s2580_s1 + $0x44] sm:$0xf]  ;;  %v1122_v4 = vor.u32 %v1610_v60, %v1121_v59 }
  0x10   :  { %429 = vmatpush.bf16.msra.mxu0 %v1154_v44  ;;  %v1123_v1 = vld [vmem:[%s2580_s1 + $0x50] sm:$0xf0]  ;;  %v1640_v2 = vld [vmem:[%s2580_s1 + $0x144] sm:$0xf]  ;;  %v1250_v5 = vor.u32 %v1642_v63, %v1249_v61  ;;  %v1105_v7 = vld [vmem:[%s2580_s1 + $0x20] sm:$0xf] }
  0x11   :  { %442 = vmatpush.bf16.msra.mxu1 %v1282_v45  ;;  %455 = vmatpush.bf16.msra.mxu2 %v1158_v46  ;;  %v1251_v3 = vld [vmem:[%s2580_s1 + $0x150] sm:$0xf0]  ;;  %v1126_v6 = vor.u32 %v1608_v0, %v1123_v1  ;;  %v1606_v8 = vld [vmem:[%s2580_s1 + $0x2c] sm:$0xf0]  ;;  %v1233_v9 = vld [vmem:[%s2580_s1 + $0x120] sm:$0xf] }
  0x12   :  { %468 = vmatpush.bf16.msra.mxu3 %v1286_v50  ;;  %v1254_v10 = vor.u32 %v1640_v2, %v1251_v3  ;;  %v1638_v11 = vld [vmem:[%s2580_s1 + $0x12c] sm:$0xf0]  ;;  %v1604_v12 = vld [vmem:[%s2580_s1 + $0x24] sm:$0xf]  ;;  %v1107_v13 = vld [vmem:[%s2580_s1 + $0x30] sm:$0xf0]  ;;  %v1106_v16 = vor.u32 %v1606_v8, %v1105_v7 }
  0x13   :  { %v1636_v14 = vld [vmem:[%s2580_s1 + $0x124] sm:$0xf]  ;;  %v1235_v15 = vld [vmem:[%s2580_s1 + $0x130] sm:$0xf0]  ;;  %v1089_v17 = vld [vmem:[%s2580_s1] sm:$0xf]  ;;  %v1234_v19 = vor.u32 %v1638_v11, %v1233_v9  ;;  %v1110_v20 = vor.u32 %v1604_v12, %v1107_v13 }
  0x14   :  { %430 = vmatpush.bf16.msra.mxu0 %v1138_v56  ;;  %v1602_v18 = vld [vmem:[%s2580_s1 + $0xc] sm:$0xf0]  ;;  %v1217_v21 = vld [vmem:[%s2580_s1 + $0x100] sm:$0xf]  ;;  %v1600_v23 = vld [vmem:[%s2580_s1 + $0x4] sm:$0xf]  ;;  %v1238_v24 = vor.u32 %v1636_v14, %v1235_v15 }
  0x15   :  { %443 = vmatpush.bf16.msra.mxu1 %v1266_v57  ;;  %456 = vmatpush.bf16.msra.mxu2 %v1142_v58  ;;  %v1634_v22 = vld [vmem:[%s2580_s1 + $0x10c] sm:$0xf0]  ;;  %v1091_v25 = vld [vmem:[%s2580_s1 + $0x10] sm:$0xf0]  ;;  %v1632_v26 = vld [vmem:[%s2580_s1 + $0x104] sm:$0xf]  ;;  %v1090_v31 = vor.u32 %v1602_v18, %v1089_v17 }
  0x16   :  { %469 = vmatpush.bf16.msra.mxu3 %v1270_v62  ;;  %v1219_v27 = vld [vmem:[%s2580_s1 + $0x110] sm:$0xf0]  ;;  %v1209_v28 = vld [vmem:[%s2580_s1 + $0xe8] sm:$0xf]  ;;  %v1631_v29 = vld [vmem:[%s2580_s1 + $0xf4] sm:$0xf0]  ;;  %v1218_v35 = vor.u32 %v1634_v22, %v1217_v21  ;;  %v1094_v36 = vor.u32 %v1600_v23, %v1091_v25 }
  0x17   :  { %v1337_v30 = vld [vmem:[%s2580_s1 + $0x1e8] sm:$0xf]  ;;  %v1663_v32 = vld [vmem:[%s2580_s1 + $0x1f4] sm:$0xf0]  ;;  %v1629_v33 = vld [vmem:[%s2580_s1 + $0xec] sm:$0xf]  ;;  %v1222_v40 = vor.u32 %v1632_v26, %v1219_v27  ;;  %v1210_v41 = vor.u32 %v1631_v29, %v1209_v28 }
  0x18   :  { %431 = vmatpush.bf16.msra.mxu0 %v1122_v4  ;;  %v1211_v34 = vld [vmem:[%s2580_s1 + $0xf8] sm:$0xf0]  ;;  %v1661_v37 = vld [vmem:[%s2580_s1 + $0x1ec] sm:$0xf]  ;;  %v28_v39 = vld [vmem:[%s2581_s0] sm:$0xff]  ;;  %v1338_v43 = vor.u32 %v1663_v32, %v1337_v30 }
  0x19   :  { %444 = vmatpush.bf16.msra.mxu1 %v1250_v5  ;;  %457 = vmatpush.bf16.msra.mxu2 %v1126_v6  ;;  %v1339_v38 = vld [vmem:[%s2580_s1 + $0x1f8] sm:$0xf0]  ;;  %v29_v42 = vld [vmem:[%s2581_s0 + $0x8] sm:$0xff]  ;;  %v1214_v44 = vor.u32 %v1629_v33, %v1211_v34  ;;  %v1627_v46 = vld [vmem:[%s2580_s1 + $0xd4] sm:$0xf0]  ;;  %v2004_v49 = vpack.c.bf16 %v28_v39, %v28_v39 }
  0x1a   :  { %470 = vmatpush.bf16.msra.mxu3 %v1254_v10  ;;  %v1193_v45 = vld [vmem:[%s2580_s1 + $0xc8] sm:$0xf]  ;;  %v1342_v48 = vor.u32 %v1661_v37, %v1339_v38  ;;  %v1659_v50 = vld [vmem:[%s2580_s1 + $0x1d4] sm:$0xf0]  ;;  %v1625_v51 = vld [vmem:[%s2580_s1 + $0xcc] sm:$0xf]  ;;  %v2015_v53 = vpack.c.bf16 %v29_v42, %v29_v42 }
  0x1b   :  { %v1321_v47 = vld [vmem:[%s2580_s1 + $0x1c8] sm:$0xf]  ;;  %v1195_v52 = vld [vmem:[%s2580_s1 + $0xd8] sm:$0xf0]  ;;  %v1657_v54 = vld [vmem:[%s2580_s1 + $0x1cc] sm:$0xf]  ;;  %v1194_v56 = vor.u32 %v1627_v46, %v1193_v45 }
  0x1c   :  { %432 = vmatpush.bf16.msra.mxu0 %v1106_v16  ;;  %v1323_v55 = vld [vmem:[%s2580_s1 + $0x1d8] sm:$0xf0]  ;;  %v1322_v57 = vor.u32 %v1659_v50, %v1321_v47  ;;  %v1198_v58 = vor.u32 %v1625_v51, %v1195_v52  ;;  %v1177_v59 = vld [vmem:[%s2580_s1 + $0xa8] sm:$0xf]  ;;  %v1623_v60 = vld [vmem:[%s2580_s1 + $0xb4] sm:$0xf0] }
  0x1d   :  { %445 = vmatpush.bf16.msra.mxu1 %v1234_v19  ;;  %458 = vmatpush.bf16.msra.mxu2 %v1110_v20  ;;  %v1305_v61 = vld [vmem:[%s2580_s1 + $0x1a8] sm:$0xf]  ;;  %v1326_v62 = vor.u32 %v1657_v54, %v1323_v55  ;;  %v1655_v63 = vld [vmem:[%s2580_s1 + $0x1b4] sm:$0xf0]  ;;  %v1621_v0 = vld [vmem:[%s2580_s1 + $0xac] sm:$0xf]  ;;  %v1178_v4 = vor.u32 %v1623_v60, %v1177_v59 }
  0x1e   :  { %471 = vmatpush.bf16.msra.mxu3 %v1238_v24  ;;  %v1179_v1 = vld [vmem:[%s2580_s1 + $0xb8] sm:$0xf0]  ;;  %v1653_v2 = vld [vmem:[%s2580_s1 + $0x1ac] sm:$0xf]  ;;  %v1306_v5 = vor.u32 %v1655_v63, %v1305_v61  ;;  %v1161_v7 = vld [vmem:[%s2580_s1 + $0x88] sm:$0xf] }
  0x1f   :  { %v1307_v3 = vld [vmem:[%s2580_s1 + $0x1b8] sm:$0xf0]  ;;  %v1182_v6 = vor.u32 %v1621_v0, %v1179_v1  ;;  %v1619_v8 = vld [vmem:[%s2580_s1 + $0x94] sm:$0xf0]  ;;  %v1289_v9 = vld [vmem:[%s2580_s1 + $0x188] sm:$0xf] }
  0x20   :  { %433 = vmatpush.bf16.msra.mxu0 %v1090_v31  ;;  %v1310_v10 = vor.u32 %v1653_v2, %v1307_v3  ;;  %v1651_v11 = vld [vmem:[%s2580_s1 + $0x194] sm:$0xf0]  ;;  %v1617_v12 = vld [vmem:[%s2580_s1 + $0x8c] sm:$0xf]  ;;  %v1163_v13 = vld [vmem:[%s2580_s1 + $0x98] sm:$0xf0]  ;;  %v1162_v16 = vor.u32 %v1619_v8, %v1161_v7 }
  0x21   :  { %446 = vmatpush.bf16.msra.mxu1 %v1218_v35  ;;  %459 = vmatpush.bf16.msra.mxu2 %v1094_v36  ;;  %v1649_v14 = vld [vmem:[%s2580_s1 + $0x18c] sm:$0xf]  ;;  %v1291_v15 = vld [vmem:[%s2580_s1 + $0x198] sm:$0xf0]  ;;  %v1290_v17 = vor.u32 %v1651_v11, %v1289_v9  ;;  %v1166_v18 = vor.u32 %v1617_v12, %v1163_v13  ;;  %v1145_v19 = vld [vmem:[%s2580_s1 + $0x68] sm:$0xf] }
  0x22   :  { %472 = vmatpush.bf16.msra.mxu3 %v1222_v40  ;;  %v1615_v20 = vld [vmem:[%s2580_s1 + $0x74] sm:$0xf0]  ;;  %v1273_v21 = vld [vmem:[%s2580_s1 + $0x168] sm:$0xf]  ;;  %v1294_v22 = vor.u32 %v1649_v14, %v1291_v15  ;;  %v1613_v24 = vld [vmem:[%s2580_s1 + $0x6c] sm:$0xf] }
  0x23   :  { %434 = vmatmul.bf16.vlgmr.msra.gmra.mxu0 %v2004_v49  ;;  %v1647_v23 = vld [vmem:[%s2580_s1 + $0x174] sm:$0xf0]  ;;  %v1147_v25 = vld [vmem:[%s2580_s1 + $0x78] sm:$0xf0]  ;;  %v1645_v26 = vld [vmem:[%s2580_s1 + $0x16c] sm:$0xf]  ;;  %v1146_v28 = vor.u32 %v1615_v20, %v1145_v19 }
  0x24   :  { %478 = vmatpush.bf16.msrb.mxu0 %v1210_v41  ;;  %460 = vmatmul.bf16.vlgmr.msra.gmra.mxu2 %v2004_v49  ;;  %v1275_v27 = vld [vmem:[%s2580_s1 + $0x178] sm:$0xf0]  ;;  %v1274_v29 = vor.u32 %v1647_v23, %v1273_v21  ;;  %v1150_v30 = vor.u32 %v1613_v24, %v1147_v25  ;;  %v1129_v31 = vld [vmem:[%s2580_s1 + $0x48] sm:$0xf]  ;;  %v1611_v32 = vld [vmem:[%s2580_s1 + $0x54] sm:$0xf0] }
  0x25   :  { %491 = vmatpush.bf16.msrb.mxu1 %v1338_v43  ;;  %504 = vmatpush.bf16.msrb.mxu2 %v1214_v44  ;;  %v1257_v33 = vld [vmem:[%s2580_s1 + $0x148] sm:$0xf]  ;;  %v1278_v34 = vor.u32 %v1645_v26, %v1275_v27  ;;  %v1643_v35 = vld [vmem:[%s2580_s1 + $0x154] sm:$0xf0]  ;;  %v1609_v36 = vld [vmem:[%s2580_s1 + $0x4c] sm:$0xf]  ;;  %v1130_v40 = vor.u32 %v1611_v32, %v1129_v31 }
  0x26   :  { %517 = vmatpush.bf16.msrb.mxu3 %v1342_v48  ;;  %447 = vmatmul.bf16.vlgmr.msra.gmra.mxu1 %v2015_v53  ;;  %v1131_v37 = vld [vmem:[%s2580_s1 + $0x58] sm:$0xf0]  ;;  %v1641_v38 = vld [vmem:[%s2580_s1 + $0x14c] sm:$0xf]  ;;  %v1258_v41 = vor.u32 %v1643_v35, %v1257_v33  ;;  %v1113_v43 = vld [vmem:[%s2580_s1 + $0x28] sm:$0xf] }
  0x27   :  { %473 = vmatmul.bf16.vlgmr.msra.gmra.mxu3 %v2015_v53  ;;  %v1259_v39 = vld [vmem:[%s2580_s1 + $0x158] sm:$0xf0]  ;;  %v1134_v42 = vor.u32 %v1609_v36, %v1131_v37  ;;  %v1607_v44 = vld [vmem:[%s2580_s1 + $0x34] sm:$0xf0]  ;;  %v1241_v45 = vld [vmem:[%s2580_s1 + $0x128] sm:$0xf] }
  0x28   :  { %479 = vmatpush.bf16.msrb.mxu0 %v1194_v56  ;;  %v1262_v46 = vor.u32 %v1641_v38, %v1259_v39  ;;  %v1639_v47 = vld [vmem:[%s2580_s1 + $0x134] sm:$0xf0]  ;;  %v1605_v48 = vld [vmem:[%s2580_s1 + $0x2c] sm:$0xf]  ;;  %v1115_v50 = vld [vmem:[%s2580_s1 + $0x38] sm:$0xf0]  ;;  %v1114_v54 = vor.u32 %v1607_v44, %v1113_v43 }
  0x29   :  { %492 = vmatpush.bf16.msrb.mxu1 %v1322_v57  ;;  %505 = vmatpush.bf16.msrb.mxu2 %v1198_v58  ;;  %v1637_v51 = vld [vmem:[%s2580_s1 + $0x12c] sm:$0xf]  ;;  %v1243_v52 = vld [vmem:[%s2580_s1 + $0x138] sm:$0xf0]  ;;  %v1097_v55 = vld [vmem:[%s2580_s1 + $0x8] sm:$0xf]  ;;  %v1242_v56 = vor.u32 %v1639_v47, %v1241_v45  ;;  %v1118_v57 = vor.u32 %v1605_v48, %v1115_v50 }
  0x2a   :  { %518 = vmatpush.bf16.msrb.mxu3 %v1326_v62  ;;  %v1603_v58 = vld [vmem:[%s2580_s1 + $0x14] sm:$0xf0]  ;;  %v1225_v59 = vld [vmem:[%s2580_s1 + $0x108] sm:$0xf]  ;;  %v1246_v61 = vor.u32 %v1637_v51, %v1243_v52  ;;  %v1601_v62 = vld [vmem:[%s2580_s1 + $0xc] sm:$0xf] }
  0x2b   :  { %v1635_v60 = vld [vmem:[%s2580_s1 + $0x114] sm:$0xf0]  ;;  %v1099_v63 = vld [vmem:[%s2580_s1 + $0x18] sm:$0xf0]  ;;  %v1633_v0 = vld [vmem:[%s2580_s1 + $0x10c] sm:$0xf] }
  0x2c   :  { %480 = vmatpush.bf16.msrb.mxu0 %v1178_v4  ;;  %v1227_v1 = vld [vmem:[%s2580_s1 + $0x118] sm:$0xf0]  ;;  %v1401_v2 = vld [vmem:[%s2582_s3 + $0x70] sm:$0xf]  ;;  %v1679_v3 = vld [vmem:[%s2582_s3 + $0x74] sm:$0xf0]  ;;  %v1098_v4 = vor.u32 %v1603_v58, %v1097_v55  ;;  %v1226_v7 = vor.u32 %v1635_v60, %v1225_v59  ;;  %v1102_v8 = vor.u32 %v1601_v62, %v1099_v63 }
  0x2d   :  { %493 = vmatpush.bf16.msrb.mxu1 %v1306_v5  ;;  %506 = vmatpush.bf16.msrb.mxu2 %v1182_v6  ;;  %v1465_v5 = vld [vmem:[%s2582_s3 + $0xf0] sm:$0xf]  ;;  %v1695_v6 = vld [vmem:[%s2582_s3 + $0xf4] sm:$0xf0]  ;;  %v1230_v9 = vor.u32 %v1633_v0, %v1227_v1  ;;  %v1393_v13 = vld [vmem:[%s2582_s3 + $0x60] sm:$0xf] }
  0x2e   :  { %519 = vmatpush.bf16.msrb.mxu3 %v1310_v10  ;;  %v1402_v10 = vor.u32 %v1679_v3, %v1401_v2  ;;  %v1529_v11 = vld [vmem:[%s2582_s3 + $0x170] sm:$0xf]  ;;  %v1711_v12 = vld [vmem:[%s2582_s3 + $0x174] sm:$0xf0]  ;;  %v1677_v14 = vld [vmem:[%s2582_s3 + $0x64] sm:$0xf0]  ;;  %v1466_v15 = vor.u32 %v1695_v6, %v1465_v5 }
  0x2f   :  { %v1394_v19 = vor.u32 %v1677_v14, %v1393_v13  ;;  %v1521_v20 = vld [vmem:[%s2582_s3 + $0x160] sm:$0xf]  ;;  %v1709_v21 = vld [vmem:[%s2582_s3 + $0x164] sm:$0xf0]  ;;  %v1675_v23 = vld [vmem:[%s2582_s3 + $0x54] sm:$0xf0] }
  0x30   :  { %481 = vmatpush.bf16.msrb.mxu0 %v1162_v16  ;;  %v1457_v16 = vld [vmem:[%s2582_s3 + $0xe0] sm:$0xf]  ;;  %v1449_v25 = vld [vmem:[%s2582_s3 + $0xd0] sm:$0xf]  ;;  %v1691_v26 = vld [vmem:[%s2582_s3 + $0xd4] sm:$0xf0]  ;;  %v1522_v27 = vor.u32 %v1709_v21, %v1521_v20 }
  0x31   :  { %494 = vmatpush.bf16.msrb.mxu1 %v1290_v17  ;;  %507 = vmatpush.bf16.msrb.mxu2 %v1166_v18  ;;  %v1693_v17 = vld [vmem:[%s2582_s3 + $0xe4] sm:$0xf0]  ;;  %v1530_v18 = vor.u32 %v1711_v12, %v1529_v11  ;;  %v1441_v31 = vld [vmem:[%s2582_s3 + $0xc0] sm:$0xf]  ;;  %v1369_v33 = vld [vmem:[%s2582_s3 + $0x30] sm:$0xf] }
  0x32   :  { %520 = vmatpush.bf16.msrb.mxu3 %v1294_v22  ;;  %v1385_v22 = vld [vmem:[%s2582_s3 + $0x50] sm:$0xf]  ;;  %v1458_v24 = vor.u32 %v1693_v17, %v1457_v16  ;;  %v1687_v37 = vld [vmem:[%s2582_s3 + $0xb4] sm:$0xf0]  ;;  %v1361_v39 = vld [vmem:[%s2582_s3 + $0x20] sm:$0xf] }
  0x33   :  { %v1433_v36 = vld [vmem:[%s2582_s3 + $0xb0] sm:$0xf]  ;;  %v1685_v43 = vld [vmem:[%s2582_s3 + $0xa4] sm:$0xf0]  ;;  %v1683_v50 = vld [vmem:[%s2582_s3 + $0x94] sm:$0xf0] }
  0x34   :  { %482 = vmatpush.bf16.msrb.mxu0 %v1146_v28  ;;  %v1386_v28 = vor.u32 %v1675_v23, %v1385_v22  ;;  %v1353_v45 = vld [vmem:[%s2582_s3 + $0x10] sm:$0xf]  ;;  %v1345_v52 = vld [vmem:[%s2582_s3] sm:$0xf]  ;;  %v1676_v60 = vld [vmem:[%s2582_s3 + $0x64] sm:$0xf] }
  0x35   :  { %495 = vmatpush.bf16.msrb.mxu1 %v1274_v29  ;;  %508 = vmatpush.bf16.msrb.mxu2 %v1150_v30  ;;  %v1377_v29 = vld [vmem:[%s2582_s3 + $0x40] sm:$0xf]  ;;  %v1450_v30 = vor.u32 %v1691_v26, %v1449_v25  ;;  %v1417_v48 = vld [vmem:[%s2582_s3 + $0x90] sm:$0xf]  ;;  %v1681_v0 = vld [vmem:[%s2582_s3 + $0x84] sm:$0xf0] }
  0x36   :  { %521 = vmatpush.bf16.msrb.mxu3 %v1278_v34  ;;  %v1671_v34 = vld [vmem:[%s2582_s3 + $0x34] sm:$0xf0]  ;;  %v1418_v55 = vor.u32 %v1683_v50, %v1417_v48  ;;  %v1409_v63 = vld [vmem:[%s2582_s3 + $0x80] sm:$0xf]  ;;  %v1593_v2 = vld [vmem:[%s2582_s3 + $0x1f0] sm:$0xf] }
  0x37   :  { %v1370_v38 = vor.u32 %v1671_v34, %v1369_v33  ;;  %v1410_v1 = vor.u32 %v1681_v0, %v1409_v63  ;;  %v1727_v3 = vld [vmem:[%s2582_s3 + $0x1f4] sm:$0xf0]  ;;  %v1467_v6 = vld [vmem:[%s2582_s3 + $0xf8] sm:$0xf0]  ;;  %v1585_v14 = vld [vmem:[%s2582_s3 + $0x1e0] sm:$0xf] }
  0x38   :  { %483 = vmatpush.bf16.msrb.mxu0 %v1130_v40  ;;  %v1669_v40 = vld [vmem:[%s2582_s3 + $0x24] sm:$0xf0]  ;;  %v1594_v5 = vor.u32 %v1727_v3, %v1593_v2  ;;  %v1387_v12 = vld [vmem:[%s2582_s3 + $0x58] sm:$0xf0]  ;;  %v1692_v16 = vld [vmem:[%s2582_s3 + $0xe4] sm:$0xf] }
  0x39   :  { %496 = vmatpush.bf16.msrb.mxu1 %v1258_v41  ;;  %509 = vmatpush.bf16.msrb.mxu2 %v1134_v42  ;;  %v1434_v41 = vor.u32 %v1687_v37, %v1433_v36  ;;  %v1425_v42 = vld [vmem:[%s2582_s3 + $0xa0] sm:$0xf]  ;;  %v1362_v44 = vor.u32 %v1669_v40, %v1361_v39  ;;  %v1705_v21 = vld [vmem:[%s2582_s3 + $0x144] sm:$0xf0]  ;;  %v1672_v22 = vld [vmem:[%s2582_s3 + $0x44] sm:$0xf] }
  0x3a   :  { %522 = vmatpush.bf16.msrb.mxu3 %v1262_v46  ;;  %v1667_v46 = vld [vmem:[%s2582_s3 + $0x14] sm:$0xf0]  ;;  %v1426_v47 = vor.u32 %v1685_v43, %v1425_v42  ;;  %v1505_v20 = vld [vmem:[%s2582_s3 + $0x140] sm:$0xf]  ;;  %v1577_v26 = vld [vmem:[%s2582_s3 + $0x1d0] sm:$0xf] }
  0x3b   :  { %v1354_v51 = vor.u32 %v1667_v46, %v1353_v45  ;;  %v1506_v23 = vor.u32 %v1705_v21, %v1505_v20  ;;  %v1371_v34 = vld [vmem:[%s2582_s3 + $0x38] sm:$0xf0]  ;;  %v1569_v36 = vld [vmem:[%s2582_s3 + $0x1c0] sm:$0xf]  ;;  %v1721_v37 = vld [vmem:[%s2582_s3 + $0x1c4] sm:$0xf0] }
  0x3c   :  { %484 = vmatpush.bf16.msrb.mxu0 %v1114_v54  ;;  %v1665_v54 = vld [vmem:[%s2582_s3 + $0x4] sm:$0xf0]  ;;  %v1570_v39 = vor.u32 %v1721_v37, %v1569_v36  ;;  %v1443_v40 = vld [vmem:[%s2582_s3 + $0xc8] sm:$0xf0]  ;;  %v1489_v42 = vld [vmem:[%s2582_s3 + $0x120] sm:$0xf] }
  0x3d   :  { %497 = vmatpush.bf16.msrb.mxu1 %v1242_v56  ;;  %510 = vmatpush.bf16.msrb.mxu2 %v1118_v57  ;;  %v1678_v56 = vld [vmem:[%s2582_s3 + $0x74] sm:$0xf]  ;;  %v1403_v57 = vld [vmem:[%s2582_s3 + $0x78] sm:$0xf0]  ;;  %v1346_v58 = vor.u32 %v1665_v54, %v1345_v52  ;;  %v1701_v43 = vld [vmem:[%s2582_s3 + $0x124] sm:$0xf0] }
  0x3e   :  { %523 = vmatpush.bf16.msrb.mxu3 %v1246_v61  ;;  %v1406_v59 = vor.u32 %v1678_v56, %v1403_v57  ;;  %v1395_v61 = vld [vmem:[%s2582_s3 + $0x68] sm:$0xf0]  ;;  %v1490_v45 = vor.u32 %v1701_v43, %v1489_v42  ;;  %v1561_v48 = vld [vmem:[%s2582_s3 + $0x1b0] sm:$0xf]  ;;  %v1719_v50 = vld [vmem:[%s2582_s3 + $0x1b4] sm:$0xf0] }
  0x3f   :  { %v1398_v62 = vor.u32 %v1676_v60, %v1395_v61  ;;  %v1363_v46 = vld [vmem:[%s2582_s3 + $0x28] sm:$0xf0]  ;;  %v1562_v52 = vor.u32 %v1719_v50, %v1561_v48  ;;  %v1435_v54 = vld [vmem:[%s2582_s3 + $0xb8] sm:$0xf0]  ;;  %v1699_v56 = vld [vmem:[%s2582_s3 + $0x114] sm:$0xf0] }
  0x40   :  { %485 = vmatpush.bf16.msrb.mxu0 %v1098_v4  ;;  %v1694_v4 = vld [vmem:[%s2582_s3 + $0xf4] sm:$0xf]  ;;  %v1355_v60 = vld [vmem:[%s2582_s3 + $0x18] sm:$0xf0]  ;;  %v1553_v61 = vld [vmem:[%s2582_s3 + $0x1a0] sm:$0xf] }
  0x41   :  { %498 = vmatpush.bf16.msrb.mxu1 %v1226_v7  ;;  %511 = vmatpush.bf16.msrb.mxu2 %v1102_v8  ;;  %v1470_v7 = vor.u32 %v1694_v4, %v1467_v6  ;;  %v1513_v8 = vld [vmem:[%s2582_s3 + $0x150] sm:$0xf]  ;;  %v1717_v63 = vld [vmem:[%s2582_s3 + $0x1a4] sm:$0xf0]  ;;  %v1684_v0 = vld [vmem:[%s2582_s3 + $0xa4] sm:$0xf] }
  0x42   :  { %524 = vmatpush.bf16.msrb.mxu3 %v1230_v9  ;;  %v1707_v9 = vld [vmem:[%s2582_s3 + $0x154] sm:$0xf0]  ;;  %v1554_v2 = vor.u32 %v1717_v63, %v1553_v61  ;;  %v1473_v4 = vld [vmem:[%s2582_s3 + $0x100] sm:$0xf]  ;;  %v1664_v6 = vld [vmem:[%s2582_s3 + $0x4] sm:$0xf] }
  0x43   :  { %486 = vmatmul.bf16.vlgmr.msrb.gmra.mxu0 %v2004_v49  ;;  %v1514_v11 = vor.u32 %v1707_v9, %v1513_v8  ;;  %v1347_v8 = vld [vmem:[%s2582_s3 + $0x8] sm:$0xf0]  ;;  %v1710_v9 = vld [vmem:[%s2582_s3 + $0x174] sm:$0xf]  ;;  %v1708_v20 = vld [vmem:[%s2582_s3 + $0x164] sm:$0xf] }
  0x44   :  { %936 = vmatpush.bf16.msra.mxu0 %v1402_v10  ;;  %499 = vmatmul.bf16.vlgmr.msrb.gmra.mxu1 %v2015_v53  ;;  %v1674_v10 = vld [vmem:[%s2582_s3 + $0x54] sm:$0xf]  ;;  %v1523_v21 = vld [vmem:[%s2582_s3 + $0x168] sm:$0xf0]  ;;  %v1724_v37 = vld [vmem:[%s2582_s3 + $0x1e4] sm:$0xf] }
  0x45   :  { %949 = vmatpush.bf16.msra.mxu1 %v1466_v15  ;;  %512 = vmatmul.bf16.vlgmr.msrb.gmra.mxu2 %v2004_v49  ;;  %v1673_v49 = vld [vmem:[%s2582_s3 + $0x44] sm:$0xf0]  ;;  %v1390_v13 = vor.u32 %v1674_v10, %v1387_v12  ;;  %v1531_v10 = vld [vmem:[%s2582_s3 + $0x178] sm:$0xf0]  ;;  %v1507_v42 = vld [vmem:[%s2582_s3 + $0x148] sm:$0xf0] }
  0x46   :  { %525 = vmatmul.bf16.vlgmr.msrb.gmra.mxu3 %v2015_v53  ;;  %962 = vmatpush.bf16.msra.mxu2 %v1530_v18  ;;  %v1689_v53 = vld [vmem:[%s2582_s3 + $0xc4] sm:$0xf0]  ;;  %v1378_v32 = vor.u32 %v1673_v49, %v1377_v29  ;;  %v1459_v18 = vld [vmem:[%s2582_s3 + $0xe8] sm:$0xf0]  ;;  %v1451_v49 = vld [vmem:[%s2582_s3 + $0xd8] sm:$0xf0]  ;;  %v1534_v12 = vor.u32 %v1710_v9, %v1531_v10 }
  0x47   :  { %v1442_v35 = vor.u32 %v1689_v53, %v1441_v31  ;;  %975 = vmatpush.bf16.msra.mxu3 %v1594_v5  ;;  %v1725_v15 = vld [vmem:[%s2582_s3 + $0x1e4] sm:$0xf0]  ;;  %v1497_v31 = vld [vmem:[%s2582_s3 + $0x130] sm:$0xf]  ;;  %v1703_v53 = vld [vmem:[%s2582_s3 + $0x134] sm:$0xf0] }
  0x48   :  { %937 = vmatpush.bf16.msra.mxu0 %v1394_v19  ;;  %v1586_v17 = vor.u32 %v1725_v15, %v1585_v14  ;;  %v1462_v19 = vor.u32 %v1692_v16, %v1459_v18  ;;  %v1498_v33 = vor.u32 %v1703_v53, %v1497_v31  ;;  %v1697_v5 = vld [vmem:[%s2582_s3 + $0x104] sm:$0xf0]  ;;  %v1715_v14 = vld [vmem:[%s2582_s3 + $0x194] sm:$0xf0]  ;;  %v1682_v15 = vld [vmem:[%s2582_s3 + $0x94] sm:$0xf] }
  0x49   :  { %950 = vmatpush.bf16.msra.mxu1 %v1458_v24  ;;  %v1379_v24 = vld [vmem:[%s2582_s3 + $0x48] sm:$0xf0]  ;;  %v2460_v18 = vld [vmem:[%s2583_s2] sm:$0xf]  ;;  %v1706_v53 = vld [vmem:[%s2582_s3 + $0x154] sm:$0xf] }
  0x4a   :  { %963 = vmatpush.bf16.msra.mxu2 %v1522_v27  ;;  %v1382_v25 = vor.u32 %v1672_v22, %v1379_v24  ;;  %v1723_v27 = vld [vmem:[%s2582_s3 + $0x1d4] sm:$0xf0]  ;;  %v98_v22 = vperm.slane %v2460_v18, 0  ;;  %v1537_v24 = vld [vmem:[%s2582_s3 + $0x180] sm:$0xf]  ;;  %v99_v43 = vperm.slane %v2460_v18, 1 }
  0x4b   :  { %976 = vmatpush.bf16.msra.mxu3 %v1586_v17  ;;  %v1578_v29 = vor.u32 %v1723_v27, %v1577_v26  ;;  %v1419_v17 = vld [vmem:[%s2582_s3 + $0x98] sm:$0xf0]  ;;  %v1680_v26 = vld [vmem:[%s2582_s3 + $0x84] sm:$0xf]  ;;  %v1698_v9 = vld [vmem:[%s2582_s3 + $0x114] sm:$0xf] }
  0x4c   :  { %938 = vmatpush.bf16.msra.mxu0 %v1386_v28  ;;  %v1690_v28 = vld [vmem:[%s2582_s3 + $0xd4] sm:$0xf]  ;;  %v1720_v61 = vld [vmem:[%s2582_s3 + $0x1c4] sm:$0xf]  ;;  %v1483_v10 = vld [vmem:[%s2582_s3 + $0x118] sm:$0xf0] }
  0x4d   :  { %951 = vmatpush.bf16.msra.mxu1 %v1450_v30  ;;  %v1454_v30 = vor.u32 %v1690_v28, %v1451_v49  ;;  %v1411_v28 = vld [vmem:[%s2582_s3 + $0x88] sm:$0xf0]  ;;  %v1595_v49 = vld [vmem:[%s2582_s3 + $0x1f8] sm:$0xf0] }
  0x4e   :  { %964 = vmatpush.bf16.msra.mxu2 %v1514_v11  ;;  %v1350_v11 = vor.u32 %v1664_v6, %v1347_v8  ;;  %v1563_v6 = vld [vmem:[%s2582_s3 + $0x1b8] sm:$0xf0] }
  0x4f   :  { %977 = vmatpush.bf16.msra.mxu3 %v1578_v29  ;;  %v1726_v29 = vld [vmem:[%s2582_s3 + $0x1f4] sm:$0xf] }
  0x50   :  { %939 = vmatpush.bf16.msra.mxu0 %v1378_v32  ;;  %v1670_v32 = vld [vmem:[%s2582_s3 + $0x34] sm:$0xf]  ;;  %v1598_v31 = vor.u32 %v1726_v29, %v1595_v49 }
  0x51   :  { %952 = vmatpush.bf16.msra.mxu1 %v1442_v35  ;;  %v1374_v35 = vor.u32 %v1670_v32, %v1371_v34  ;;  %v1515_v32 = vld [vmem:[%s2582_s3 + $0x158] sm:$0xf0] }
  0x52   :  { %965 = vmatpush.bf16.msra.mxu2 %v1506_v23  ;;  %v1526_v23 = vor.u32 %v1708_v20, %v1523_v21  ;;  %v1518_v34 = vor.u32 %v1706_v53, %v1515_v32  ;;  %v101_v53 = vperm.slane %v2460_v18, 3 }
  0x53   :  { %978 = vmatpush.bf16.msra.mxu3 %v1570_v39 }
  0x54   :  { %940 = vmatpush.bf16.msra.mxu0 %v1370_v38  ;;  %v1688_v38 = vld [vmem:[%s2582_s3 + $0xc4] sm:$0xf] }
  0x55   :  { %953 = vmatpush.bf16.msra.mxu1 %v1434_v41  ;;  %v1446_v41 = vor.u32 %v1688_v38, %v1443_v40  ;;  %v1587_v38 = vld [vmem:[%s2582_s3 + $0x1e8] sm:$0xf0] }
  0x56   :  { %966 = vmatpush.bf16.msra.mxu2 %v1498_v33  ;;  %v1590_v39 = vor.u32 %v1724_v37, %v1587_v38 }
  0x57   :  { %979 = vmatpush.bf16.msra.mxu3 %v1562_v52  ;;  %v1702_v52 = vld [vmem:[%s2582_s3 + $0x134] sm:$0xf] }
  0x58   :  { %941 = vmatpush.bf16.msra.mxu0 %v1362_v44  ;;  %v1668_v44 = vld [vmem:[%s2582_s3 + $0x24] sm:$0xf] }
  0x59   :  { %954 = vmatpush.bf16.msra.mxu1 %v1426_v47  ;;  %v1366_v47 = vor.u32 %v1668_v44, %v1363_v46  ;;  %v1722_v46 = vld [vmem:[%s2582_s3 + $0x1d4] sm:$0xf] }
  0x5a   :  { %967 = vmatpush.bf16.msra.mxu2 %v1490_v45 }
  0x5b   :  { %980 = vmatpush.bf16.msra.mxu3 %v1554_v2  ;;  %v1491_v2 = vld [vmem:[%s2582_s3 + $0x128] sm:$0xf0] }
  0x5c   :  { %942 = vmatpush.bf16.msra.mxu0 %v1354_v51  ;;  %v1686_v51 = vld [vmem:[%s2582_s3 + $0xb4] sm:$0xf] }
  0x5d   :  { %955 = vmatpush.bf16.msra.mxu1 %v1418_v55  ;;  %v1481_v55 = vld [vmem:[%s2582_s3 + $0x110] sm:$0xf]  ;;  %v1438_v57 = vor.u32 %v1686_v51, %v1435_v54  ;;  %v1499_v54 = vld [vmem:[%s2582_s3 + $0x138] sm:$0xf0] }
  0x60   :  { %943 = vmatpush.bf16.msra.mxu0 %v1346_v58  ;;  %v1482_v58 = vor.u32 %v1699_v56, %v1481_v55 }
  0x61   :  { %956 = vmatpush.bf16.msra.mxu1 %v1410_v1  ;;  %v1427_v1 = vld [vmem:[%s2582_s3 + $0xa8] sm:$0xf0] }
  0x62   :  { %v1430_v3 = vor.u32 %v1684_v0, %v1427_v1  ;;  %968 = vmatpush.bf16.msra.mxu2 %v1482_v58  ;;  %v1700_v1 = vld [vmem:[%s2582_s3 + $0x124] sm:$0xf] }
  0x64   :  { %988 = vmatpush.bf16.msrb.mxu0 %v1406_v59  ;;  %v1666_v59 = vld [vmem:[%s2582_s3 + $0x14] sm:$0xf] }
  0x65   :  { %1001 = vmatpush.bf16.msrb.mxu1 %v1470_v7  ;;  %v1474_v7 = vor.u32 %v1697_v5, %v1473_v4  ;;  %v1494_v4 = vor.u32 %v1700_v1, %v1491_v2  ;;  %v1718_v5 = vld [vmem:[%s2582_s3 + $0x1b4] sm:$0xf] }
  0x66   :  { %v1566_v8 = vor.u32 %v1718_v5, %v1563_v6 }
  0x67   :  { %969 = vmatpush.bf16.msra.mxu2 %v1474_v7 }
  0x68   :  { %989 = vmatpush.bf16.msrb.mxu0 %v1398_v62  ;;  %v1358_v62 = vor.u32 %v1666_v59, %v1355_v60  ;;  %v1502_v59 = vor.u32 %v1702_v52, %v1499_v54 }
  0x69   :  { %1002 = vmatpush.bf16.msrb.mxu1 %v1462_v19  ;;  %v1422_v19 = vor.u32 %v1682_v15, %v1419_v17  ;;  %v1555_v15 = vld [vmem:[%s2582_s3 + $0x1a8] sm:$0xf0] }
  0x6a   :  { %v1475_v17 = vld [vmem:[%s2582_s3 + $0x108] sm:$0xf0] }
  0x6b   :  { %1014 = vmatpush.bf16.msrb.mxu2 %v1534_v12 }
  0x6c   :  { %990 = vmatpush.bf16.msrb.mxu0 %v1390_v13  ;;  %v1545_v13 = vld [vmem:[%s2582_s3 + $0x190] sm:$0xf] }
  0x6d   :  { %1003 = vmatpush.bf16.msrb.mxu1 %v1454_v30  ;;  %v1546_v16 = vor.u32 %v1715_v14, %v1545_v13  ;;  %v1414_v30 = vor.u32 %v1680_v26, %v1411_v28  ;;  %v1486_v14 = vor.u32 %v1698_v9, %v1483_v10  ;;  %v1539_v26 = vld [vmem:[%s2582_s3 + $0x188] sm:$0xf0]  ;;  %v100_v28 = vperm.slane %v2460_v18, 2 }
  0x6f   :  { %981 = vmatpush.bf16.msra.mxu3 %v1546_v16  ;;  %1015 = vmatpush.bf16.msrb.mxu2 %v1526_v23  ;;  %v1696_v16 = vld [vmem:[%s2582_s3 + $0x104] sm:$0xf]  ;;  %v1547_v23 = vld [vmem:[%s2582_s3 + $0x198] sm:$0xf0] }
  0x70   :  { %991 = vmatpush.bf16.msrb.mxu0 %v1382_v25  ;;  %v1713_v25 = vld [vmem:[%s2582_s3 + $0x184] sm:$0xf0]  ;;  %v1478_v21 = vor.u32 %v1696_v16, %v1475_v17 }
  0x71   :  { %1004 = vmatpush.bf16.msrb.mxu1 %v1446_v41  ;;  %v1538_v27 = vor.u32 %v1713_v25, %v1537_v24  ;;  %v1704_v41 = vld [vmem:[%s2582_s3 + $0x144] sm:$0xf] }
  0x72   :  { %v1510_v44 = vor.u32 %v1704_v41, %v1507_v42  ;;  %v1712_v25 = vld [vmem:[%s2582_s3 + $0x184] sm:$0xf] }
  0x73   :  { %982 = vmatpush.bf16.msra.mxu3 %v1538_v27  ;;  %1016 = vmatpush.bf16.msrb.mxu2 %v1518_v34  ;;  %v1542_v27 = vor.u32 %v1712_v25, %v1539_v26 }
  0x74   :  { %992 = vmatpush.bf16.msrb.mxu0 %v1374_v35 }
  0x75   :  { %1005 = vmatpush.bf16.msrb.mxu1 %v1438_v57 }
  0x77   :  { %1027 = vmatpush.bf16.msrb.mxu3 %v1598_v31  ;;  %1017 = vmatpush.bf16.msrb.mxu2 %v1510_v44 }
  0x78   :  { %993 = vmatpush.bf16.msrb.mxu0 %v1366_v47  ;;  %v1579_v47 = vld [vmem:[%s2582_s3 + $0x1d8] sm:$0xf0] }
  0x79   :  { %1006 = vmatpush.bf16.msrb.mxu1 %v1430_v3  ;;  %v1582_v51 = vor.u32 %v1722_v46, %v1579_v47 }
  0x7b   :  { %1028 = vmatpush.bf16.msrb.mxu3 %v1590_v39  ;;  %1018 = vmatpush.bf16.msrb.mxu2 %v1502_v59 }
  0x7c   :  { %994 = vmatpush.bf16.msrb.mxu0 %v1358_v62  ;;  %v1571_v62 = vld [vmem:[%s2582_s3 + $0x1c8] sm:$0xf0] }
  0x7d   :  { %1007 = vmatpush.bf16.msrb.mxu1 %v1422_v19  ;;  %v1574_v0 = vor.u32 %v1720_v61, %v1571_v62 }
  0x7f   :  { %1029 = vmatpush.bf16.msrb.mxu3 %v1582_v51  ;;  %1019 = vmatpush.bf16.msrb.mxu2 %v1494_v4 }
  0x80   :  { %995 = vmatpush.bf16.msrb.mxu0 %v1350_v11  ;;  %v1716_v11 = vld [vmem:[%s2582_s3 + $0x1a4] sm:$0xf] }
  0x81   :  { %1008 = vmatpush.bf16.msrb.mxu1 %v1414_v30  ;;  %v1558_v20 = vor.u32 %v1716_v11, %v1555_v15 }
  0x83   :  { %1030 = vmatpush.bf16.msrb.mxu3 %v1574_v0  ;;  %1020 = vmatpush.bf16.msrb.mxu2 %v1486_v14 }
  0x87   :  { %1031 = vmatpush.bf16.msrb.mxu3 %v1566_v8  ;;  %1021 = vmatpush.bf16.msrb.mxu2 %v1478_v21  ;;  %v1046_v8 = vld [vmem:[%s2586_s5] sm:$0x3] }
  0x8b   :  { %1032 = vmatpush.bf16.msrb.mxu3 %v1558_v20 }
  0xa0   :  { %v435_v33 = vpop.f32.mrf.mxu0 }
  0xa1   :  { %v436_v35 = vadd.f32 %v435_v33, %v98_v22  ;;  %v1714_v22 = vld [vmem:[%s2582_s3 + $0x194] sm:$0xf] }
  0xa2   :  { %v1550_v24 = vor.u32 %v1714_v22, %v1547_v23 }
  0xa3   :  { %v448_v36 = vpop.f32.mrf.mxu1 }
  0xa4   :  { %v449_v40 = vadd.f32 %v448_v36, %v436_v35  ;;  %1033 = vmatpush.bf16.msrb.mxu3 %v1550_v24 }
  0xa6   :  { %vm530_vm0 = vcmp.gt.f32.partialorder %v449_v40, 0.0  ;;  %v534_v45 = vmul.f32 0.2, %v449_v40 }
  0xa7   :  { %v461_v50 = vpop.f32.mrf.mxu2 }
  0xa8   :  { %v538_v48 = vsel %vm530_vm0, %v449_v40, %v534_v45  ;;  %v462_v56 = vadd.f32 %v461_v50, %v99_v43  ;;  %v437_v58 = vpop.f32.mrf.mxu0  ;;  %1034 = vmatpush.bf16.msrb.mxu3 %v1542_v27 }
  0xa9   :  { %v542_v55 = vpack.c.bf16 %v538_v48, %v538_v48 }
  0xaa   :  { %v474_v57 = vpop.f32.mrf.mxu3 }
  0xab   :  { %v450_v60 = vpop.f32.mrf.mxu1  ;;  %v475_v63 = vadd.f32 %v474_v57, %v462_v56  ;;  %944 = vmatmul.bf16.vlgmr.msra.gmra.mxu0 %v542_v55  ;;  %v12_v56 = vstv %s2584_s6  ;;  %v610_v57 = vld [vmem:[%s2585_s4] sm:$0x3] }
  0xac   :  { %13 = vst [vmem:[#allocation2] sm:$0x1] %v12_v56  ;;  %v612_v58 = vperm.slane %v610_v57, 0 }
  0xad   :  { %vm531_vm1 = vcmp.gt.f32.partialorder %v475_v63, 0.0  ;;  %v535_v3 = vmul.f32 0.2, %v475_v63 }
  0xaf   :  { %v539_v7 = vsel %vm531_vm1, %v475_v63, %v535_v3  ;;  %v463_v13 = vpop.f32.mrf.mxu2  ;;  %v613_v63 = vperm.slane %v610_v57, 1 }
  0xb0   :  { %v543_v12 = vpack.c.bf16 %v539_v7, %v539_v7  ;;  %v1049_v13 = vperm.slane %v1046_v8, 1 }
  0xb2   :  { %v476_v19 = vpop.f32.mrf.mxu3  ;;  %957 = vmatmul.bf16.vlgmr.msra.gmra.mxu1 %v543_v12 }
  0xb3   :  { %v1728_v22 = vld [vmem:[#allocation2] ss:$0 sm:$0xff] }
  0xbb   :  { %996 = vmatmul.bf16.vlgmr.msrb.gmra.mxu0 %v542_v55 }
  0xc0   :  { %v487_v29 = vpop.f32.mrf.mxu0 }
  0xc1   :  { %v488_v49 = vadd.f32 %v487_v29, %v100_v28  ;;  %v500_v30 = vpop.f32.mrf.mxu1 }
  0xc2   :  { %1009 = vmatmul.bf16.vlgmr.msrb.gmra.mxu1 %v543_v12  ;;  %v1048_v12 = vperm.slane %v1046_v8, 0 }
  0xc3   :  { %v501_v31 = vadd.f32 %v500_v30, %v488_v49 }
  0xc5   :  { %vm532_vm2 = vcmp.gt.f32.partialorder %v501_v31, 0.0  ;;  %v536_v32 = vmul.f32 0.2, %v501_v31 }
  0xc7   :  { %v540_v33 = vsel %vm532_vm2, %v501_v31, %v536_v32 }
  0xc8   :  { %v513_v34 = vpop.f32.mrf.mxu2  ;;  %v544_v35 = vpack.c.bf16 %v540_v33, %v540_v33  ;;  %v489_v38 = vpop.f32.mrf.mxu0 }
  0xc9   :  { %v514_v36 = vadd.f32 %v513_v34, %v101_v53  ;;  %v526_v37 = vpop.f32.mrf.mxu3  ;;  %v502_v39 = vpop.f32.mrf.mxu1 }
  0xca   :  { %970 = vmatmul.bf16.vlgmr.msra.gmra.mxu2 %v544_v35 }
  0xcb   :  { %v527_v40 = vadd.f32 %v526_v37, %v514_v36 }
  0xcd   :  { %vm533_vm3 = vcmp.gt.f32.partialorder %v527_v40, 0.0  ;;  %v537_v41 = vmul.f32 0.2, %v527_v40 }
  0xcf   :  { %v541_v42 = vsel %vm533_vm3, %v527_v40, %v537_v41 }
  0xd0   :  { %v545_v43 = vpack.c.bf16 %v541_v42, %v541_v42  ;;  %v515_v44 = vpop.f32.mrf.mxu2 }
  0xd1   :  { %v528_v45 = vpop.f32.mrf.mxu3 }
  0xd2   :  { %983 = vmatmul.bf16.vlgmr.msra.gmra.mxu3 %v545_v43 }
  0xda   :  { %1022 = vmatmul.bf16.vlgmr.msrb.gmra.mxu2 %v544_v35 }
  0xe2   :  { %1035 = vmatmul.bf16.vlgmr.msrb.gmra.mxu3 %v545_v43 }
 0x128   :  { %v945_v18 = vpop.f32.mrf.mxu0 }
 0x129   :  { %v946_v61 = vadd.f32 %v945_v18, %v612_v58 }
 0x12f   :  { %v958_v46 = vpop.f32.mrf.mxu1 }
 0x130   :  { %v947_v47 = vpop.f32.mrf.mxu0  ;;  %v959_v62 = vadd.f32 %v958_v46, %v946_v61 }
 0x137   :  { %v960_v48 = vpop.f32.mrf.mxu1 }
 0x138   :  { %v997_v50 = vpop.f32.mrf.mxu0 }
 0x139   :  { %v998_v3 = vadd.f32 %v997_v50, %v613_v63 }
 0x13f   :  { %v1010_v51 = vpop.f32.mrf.mxu1 }
 0x140   :  { %v999_v52 = vpop.f32.mrf.mxu0  ;;  %v1011_v5 = vadd.f32 %v1010_v51, %v998_v3 }
 0x147   :  { %v1012_v54 = vpop.f32.mrf.mxu1 }
 0x14d   :  { %v971_v55 = vpop.f32.mrf.mxu2 }
 0x14e   :  { %v972_v1 = vadd.f32 %v971_v55, %v959_v62 }
 0x155   :  { %v984_v59 = vpop.f32.mrf.mxu3  ;;  %v973_v60 = vpop.f32.mrf.mxu2 }
 0x156   :  { %v985_v4 = vadd.f32 %v984_v59, %v972_v1 }
 0x158   :  { %v1042_v6 = vmul.f32 0.2, %v985_v4  ;;  %vm1040_vm4 = vcmp.gt.f32.partialorder %v985_v4, 0.0 }
 0x15a   :  { %v1044_v15 = vsel %vm1040_vm4, %v985_v4, %v1042_v6 }
 0x15b   :  { %v1052_v17 = vmul.f32 %v1048_v12, %v1044_v15 }
 0x15d   :  { %v986_v0 = vpop.f32.mrf.mxu3  ;;  %v1023_v2 = vpop.f32.mrf.mxu2 }
 0x15e   :  { %v1024_v7 = vadd.f32 %v1023_v2, %v1011_v5 }
 0x165   :  { %v1036_v9 = vpop.f32.mrf.mxu3  ;;  %v1025_v11 = vpop.f32.mrf.mxu2 }
 0x166   :  { %v1037_v10 = vadd.f32 %v1036_v9, %v1024_v7 }
 0x168   :  { %vm1041_vm5 = vcmp.gt.f32.partialorder %v1037_v10, 0.0  ;;  %v1043_v14 = vmul.f32 0.2, %v1037_v10 }
 0x16a   :  { %v1045_v16 = vsel %vm1041_vm5, %v1037_v10, %v1043_v14 }
 0x16b   :  { %v1053_v19 = vmul.f32 %v1049_v13, %v1045_v16 }
 0x16d   :  { %v1038_v20 = vpop.f32.mrf.mxu3  ;;  %v1054_v21 = vadd.f32 %v1053_v19, %v1052_v17 }
 0x16f   :  { %1055 = vadd.xlane.f32.xlu0 %v1054_v21 }
 0x1e2   :  { %v1056_v23 = vpop.xlane.xlu0 %1055 }
 0x1e3   :  { %v1061_v24 = vadd.f32 %v1728_v22, %v1056_v23 }
 0x1e5   :  { %v1599_v25 = vmul.f32 -1.442695, %v1061_v24 }
 0x1e7   :  { %1729 = vpow2.f32 %v1599_v25 }
 0x1ed   :  { %v1730_v26 = vpop.eup %1729 }
 0x1ee   :  { %v1065_v27 = vadd.f32 1.0, %v1730_v26 }
 0x1f0   :  { %1731 = vrcp.f32 %v1065_v27  ;;  %v1077_v30 = vand.u32 2147483648, %v1065_v27  ;;  %v1075_v53 = vand.u32 2147483647, %v1065_v27  ;;  %vm1071_vm7 = vweird.f32 %v1065_v27 }
 0x1f2   :  { %v1078_v33 = vor.u32 1.1754944e-38, %v1077_v30  ;;  %vm1076_vm10 = vcmp.eq.f32.partialorder %v1075_v53, 8.507059e+37 }
 0x1f6   :  { %v1732_v28 = vpop.eup %1731 }
 0x1f7   :  { %v1067_v29 = vmul.f32 %v1732_v28, %v1065_v27  ;;  %vm1072_vm6 = vweird.f32 %v1732_v28 }
 0x1f8   :  { %vm1073_vm8 = vmor %vm1071_vm7, %vm1072_vm6 }
 0x1f9   :  { %v1068_v49 = vsub.f32 1.0, %v1067_v29 }
 0x1fb   :  { %v1069_v31 = vmul.f32 %v1732_v28, %v1068_v49 }
 0x1fd   :  { %v1070_v32 = vadd.f32 %v1732_v28, %v1069_v31 }
 0x1ff   :  { %v1074_v34 = vsel %vm1073_vm8, %v1732_v28, %v1070_v32 }
 0x200   :  { %v1079_v35 = vsel %vm1076_vm10, %v1078_v33, %v1074_v34 }
 0x201   :  { %1082 = vst.msk [vmem:[%s2587_s7] sm:$0xff] %vm1081_vm9, %v1079_v35 }

</bundles_post_ra>
